<compile_context>
chip_gen: v7x
topology: tpu7x:2x2x1
jax: 0.10.0
libtpu: 0.0.40
codegen_flags: <defaults>
</compile_context>

<pallas_src>
import jax
import jax.numpy as jnp
from jax.experimental import pallas as pl


# ---------------------------------------------------------------------------
# Fused Pallas kernel: the whole stacked-LSTM forward step (all layers).
# ---------------------------------------------------------------------------
def _make_stacked_lstm_kernel(num_layers, h_size, out_width):
    """Builds a kernel with refs:  x, [h, c, w_cat, bias] * num_layers, out."""

    def kernel(*refs):
        x_ref = refs[0]
        layer_refs = refs[1:1 + 4 * num_layers]
        out_ref = refs[1 + 4 * num_layers]

        B = x_ref.shape[0]
        H = h_size

        inp = x_ref[...].astype(jnp.float32)
        pieces = []

        for l in range(num_layers):
            h_ref, c_ref, w_ref, b_ref = layer_refs[4 * l:4 * l + 4]
            h = h_ref[...].astype(jnp.float32)
            c = c_ref[...].astype(jnp.float32)

            # Fused matmul: [x|h] (B, I+H)  @  [W_ih^T ; W_hh^T] (I+H, 4H)
            xh = jnp.concatenate([inp, h], axis=-1)
            gates = (
                jnp.dot(xh, w_ref[...], preferred_element_type=jnp.float32)
                + b_ref[...].astype(jnp.float32)
            )

            # One sigmoid + one tanh over the full (B, 4H) tile, then slice.
            sig_all = jax.nn.sigmoid(gates)
            tanh_all = jnp.tanh(gates)
            i_g = sig_all[:, 0 * H:1 * H]
            f_g = sig_all[:, 1 * H:2 * H]
            g_g = tanh_all[:, 2 * H:3 * H]
            o_g = sig_all[:, 3 * H:4 * H]

            c_new = f_g * c + i_g * g_g
            h_new = o_g * jnp.tanh(c_new)

            pieces.append(h_new)
            pieces.append(c_new)
            inp = h_new  # feed h' of layer l to layer l+1

        # Assemble one lane-dense output slab and do a single full-width store.
        slab = jnp.concatenate(pieces, axis=-1)          # (B, L*2*H)
        pad = out_width - slab.shape[-1]
        if pad > 0:
            slab = jnp.concatenate(
                [slab, jnp.zeros((B, pad), slab.dtype)], axis=-1)
        out_ref[...] = slab.astype(out_ref.dtype)

    return kernel


def _full_spec(shape):
    n = len(shape)
    return pl.BlockSpec(shape, lambda n=n: (0,) * n)


# ---------------------------------------------------------------------------
# StackedRNNCell forward: one pallas_call for the whole stack.
# ---------------------------------------------------------------------------
def stacked_rnn_cell_forward(x, hiddens, params):
    """params: list of per-layer dicts with 'w_cat' ((I_l+H, 4H)) and 'bias' ((1, 4H)).
    hiddens: list of (h, c) tuples, one per layer.
    Returns list of (h_out, c_out) tuples (same convention as the torch code).
    """
    B = x.shape[0]
    L = len(params)
    H = hiddens[0][0].shape[1]
    out_width = ((L * 2 * H + 127) // 128) * 128   # lane-dense output slab

    args = [x]
    in_specs = [_full_spec(x.shape)]
    for p, (h, c) in zip(params, hiddens):
        for a in (h, c, p["w_cat"], p["bias"]):
            args.append(a)
            in_specs.append(_full_spec(a.shape))

    slab = pl.pallas_call(
        _make_stacked_lstm_kernel(L, H, out_width),
        out_shape=jax.ShapeDtypeStruct((B, out_width), jnp.float32),
        in_specs=in_specs,
        out_specs=_full_spec((B, out_width)),
    )(*args)

    outs = []
    for l in range(L):
        h_new = slab[:, l * 2 * H:l * 2 * H + H].astype(x.dtype)
        c_new = slab[:, l * 2 * H + H:(l + 1) * 2 * H].astype(x.dtype)
        outs.append((h_new, c_new))
    return outs


# ---------------------------------------------------------------------------
# Deterministic parameter init (PyTorch LSTMCell uses U(-1/sqrt(H), 1/sqrt(H))).
# Weights are stored pre-fused: w_cat = [W_ih^T ; W_hh^T]  (I_l+H, 4H),
# bias = b_ih + b_hh  (1, 4H).
# ---------------------------------------------------------------------------
def init_params(key, in_size, h_size, num_layers, dtype=jnp.float32):
    params = []
    bound = 1.0 / (h_size ** 0.5)
    cur_in = in_size
    for _ in range(num_layers):
        key, k1, k2, k3, k4 = jax.random.split(key, 5)
        w_ih = jax.random.uniform(k1, (4 * h_size, cur_in), dtype, -bound, bound)
        w_hh = jax.random.uniform(k2, (4 * h_size, h_size), dtype, -bound, bound)
        b_ih = jax.random.uniform(k3, (4 * h_size,), dtype, -bound, bound)
        b_hh = jax.random.uniform(k4, (4 * h_size,), dtype, -bound, bound)
        params.append({
            "w_cat": jnp.concatenate([w_ih.T, w_hh.T], axis=0),  # (cur_in+H, 4H)
            "bias": (b_ih + b_hh).reshape(1, -1),                 # (1, 4H)
            # kept for the pure-JAX reference:
            "w_ih_t": w_ih.T,
            "w_hh_t": w_hh.T,
        })
        cur_in = h_size
    return params


# ---------------------------------------------------------------------------
# Pure-JAX reference (mirrors torch.nn.LSTMCell) for correctness checking.
# ---------------------------------------------------------------------------
def _ref_forward(x, hiddens, params):
    inp = x
    outs = []
    for p, (h, c) in zip(params, hiddens):
        gates = inp @ p["w_ih_t"] + h @ p["w_hh_t"] + p["bias"]
        H = h.shape[1]
        i = jax.nn.sigmoid(gates[:, :H])
        f = jax.nn.sigmoid(gates[:, H:2 * H])
        g = jnp.tanh(gates[:, 2 * H:3 * H])
        o = jax.nn.sigmoid(gates[:, 3 * H:])
        c_new = f * c + i * g
        h_new = o * jnp.tanh(c_new)
        outs.append((h_new, c_new))
        inp = h_new
    return outs


if __name__ == "__main__":
    BATCH = 8
    IN_SIZE = 32
    H_SIZE = 32
    NUM_LAYERS = 3

    key = jax.random.PRNGKey(0)
    key, kx, kh, kc = jax.random.split(key, 4)

    params = init_params(key, IN_SIZE, H_SIZE, NUM_LAYERS)

    x = jax.random.normal(kx, (BATCH, IN_SIZE), jnp.float32)
    h_keys = jax.random.split(kh, NUM_LAYERS)
    c_keys = jax.random.split(kc, NUM_LAYERS)
    hiddens = [
        (jax.random.normal(h_keys[l], (BATCH, H_SIZE), jnp.float32),
         jax.random.normal(c_keys[l], (BATCH, H_SIZE), jnp.float32))
        for l in range(NUM_LAYERS)
    ]

    out = stacked_rnn_cell_forward(x, hiddens, params)
    out = jax.block_until_ready(out)

    ref = _ref_forward(x, hiddens, params)
    for (h_k, c_k), (h_r, c_r) in zip(out, ref):
        assert jnp.allclose(h_k, h_r, atol=1e-4, rtol=1e-4)
        assert jnp.allclose(c_k, c_r, atol=1e-4, rtol=1e-4)

    print("KERNEL_OK")
</pallas_src>

<mosaic_0001>
module attributes {stable_mosaic.version = 11 : i64} {
  func.func @kernel(%arg0: memref<8x32xf32, #tpu.memory_space<vmem>>, %arg1: memref<8x32xf32, #tpu.memory_space<vmem>>, %arg2: memref<8x32xf32, #tpu.memory_space<vmem>>, %arg3: memref<64x128xf32, #tpu.memory_space<vmem>>, %arg4: memref<1x128xf32, #tpu.memory_space<vmem>>, %arg5: memref<8x32xf32, #tpu.memory_space<vmem>>, %arg6: memref<8x32xf32, #tpu.memory_space<vmem>>, %arg7: memref<64x128xf32, #tpu.memory_space<vmem>>, %arg8: memref<1x128xf32, #tpu.memory_space<vmem>>, %arg9: memref<8x32xf32, #tpu.memory_space<vmem>>, %arg10: memref<8x32xf32, #tpu.memory_space<vmem>>, %arg11: memref<64x128xf32, #tpu.memory_space<vmem>>, %arg12: memref<1x128xf32, #tpu.memory_space<vmem>>, %arg13: memref<8x256xf32, #tpu.memory_space<vmem>>) attributes {dimension_semantics = [], scalar_prefetch = 0 : i64, scratch_operands = 0 : i64, tpu.core_type = #tpu.core_type<tc>} {
    %c0 = arith.constant 0 : index
    %c0_0 = arith.constant 0 : index
    %0 = vector.load %arg0[%c0, %c0_0] : memref<8x32xf32, #tpu.memory_space<vmem>>, vector<8x32xf32>
    %c0_1 = arith.constant 0 : index
    %c0_2 = arith.constant 0 : index
    %1 = vector.load %arg1[%c0_1, %c0_2] : memref<8x32xf32, #tpu.memory_space<vmem>>, vector<8x32xf32>
    %c0_3 = arith.constant 0 : index
    %c0_4 = arith.constant 0 : index
    %2 = vector.load %arg2[%c0_3, %c0_4] : memref<8x32xf32, #tpu.memory_space<vmem>>, vector<8x32xf32>
    %3 = tpu.concatenate %0, %1 in 1 : vector<8x32xf32>, vector<8x32xf32> -> vector<8x64xf32>
    %c0_5 = arith.constant 0 : index
    %c0_6 = arith.constant 0 : index
    %4 = vector.load %arg3[%c0_5, %c0_6] : memref<64x128xf32, #tpu.memory_space<vmem>>, vector<64x128xf32>
    %cst = arith.constant dense<0.000000e+00> : vector<8x128xf32>
    %5 = tpu.matmul %3, %4, %cst {dimension_numbers = #tpu.dot_dimension_numbers<[1], [0], [0], [1], [0, 0, 1, 1], [], []>} : vector<8x64xf32>, vector<64x128xf32>, vector<8x128xf32> -> vector<8x128xf32>
    %c0_7 = arith.constant 0 : index
    %c0_8 = arith.constant 0 : index
    %6 = vector.load %arg4[%c0_7, %c0_8] : memref<1x128xf32, #tpu.memory_space<vmem>>, vector<1x128xf32>
    %7 = vector.broadcast %6 : vector<1x128xf32> to vector<8x128xf32>
    %8 = arith.addf %5, %7 : vector<8x128xf32>
    %9 = arith.negf %8 : vector<8x128xf32>
    %10 = math.exp %9 : vector<8x128xf32>
    %cst_9 = arith.constant 1.000000e+00 : f32
    %11 = vector.broadcast %cst_9 : f32 to vector<8x128xf32>
    %12 = arith.addf %11, %10 : vector<8x128xf32>
    %13 = arith.divf %11, %12 : vector<8x128xf32>
    %14 = math.tanh %8 : vector<8x128xf32>
    %15 = vector.extract_strided_slice %13 {offsets = [0, 0], sizes = [8, 32], strides = [1, 1]} : vector<8x128xf32> to vector<8x32xf32>
    %16 = vector.extract_strided_slice %13 {offsets = [0, 32], sizes = [8, 32], strides = [1, 1]} : vector<8x128xf32> to vector<8x32xf32>
    %17 = vector.extract_strided_slice %14 {offsets = [0, 64], sizes = [8, 32], strides = [1, 1]} : vector<8x128xf32> to vector<8x32xf32>
    %18 = vector.extract_strided_slice %13 {offsets = [0, 96], sizes = [8, 32], strides = [1, 1]} : vector<8x128xf32> to vector<8x32xf32>
    %19 = arith.mulf %16, %2 : vector<8x32xf32>
    %20 = arith.mulf %15, %17 : vector<8x32xf32>
    %21 = arith.addf %19, %20 : vector<8x32xf32>
    %22 = math.tanh %21 : vector<8x32xf32>
    %23 = arith.mulf %18, %22 : vector<8x32xf32>
    %c0_10 = arith.constant 0 : index
    %c0_11 = arith.constant 0 : index
    %24 = vector.load %arg5[%c0_10, %c0_11] : memref<8x32xf32, #tpu.memory_space<vmem>>, vector<8x32xf32>
    %c0_12 = arith.constant 0 : index
    %c0_13 = arith.constant 0 : index
    %25 = vector.load %arg6[%c0_12, %c0_13] : memref<8x32xf32, #tpu.memory_space<vmem>>, vector<8x32xf32>
    %26 = tpu.concatenate %23, %24 in 1 : vector<8x32xf32>, vector<8x32xf32> -> vector<8x64xf32>
    %c0_14 = arith.constant 0 : index
    %c0_15 = arith.constant 0 : index
    %27 = vector.load %arg7[%c0_14, %c0_15] : memref<64x128xf32, #tpu.memory_space<vmem>>, vector<64x128xf32>
    %cst_16 = arith.constant dense<0.000000e+00> : vector<8x128xf32>
    %28 = tpu.matmul %26, %27, %cst_16 {dimension_numbers = #tpu.dot_dimension_numbers<[1], [0], [0], [1], [0, 0, 1, 1], [], []>} : vector<8x64xf32>, vector<64x128xf32>, vector<8x128xf32> -> vector<8x128xf32>
    %c0_17 = arith.constant 0 : index
    %c0_18 = arith.constant 0 : index
    %29 = vector.load %arg8[%c0_17, %c0_18] : memref<1x128xf32, #tpu.memory_space<vmem>>, vector<1x128xf32>
    %30 = vector.broadcast %29 : vector<1x128xf32> to vector<8x128xf32>
    %31 = arith.addf %28, %30 : vector<8x128xf32>
    %32 = arith.negf %31 : vector<8x128xf32>
    %33 = math.exp %32 : vector<8x128xf32>
    %cst_19 = arith.constant 1.000000e+00 : f32
    %34 = vector.broadcast %cst_19 : f32 to vector<8x128xf32>
    %35 = arith.addf %34, %33 : vector<8x128xf32>
    %36 = arith.divf %34, %35 : vector<8x128xf32>
    %37 = math.tanh %31 : vector<8x128xf32>
    %38 = vector.extract_strided_slice %36 {offsets = [0, 0], sizes = [8, 32], strides = [1, 1]} : vector<8x128xf32> to vector<8x32xf32>
    %39 = vector.extract_strided_slice %36 {offsets = [0, 32], sizes = [8, 32], strides = [1, 1]} : vector<8x128xf32> to vector<8x32xf32>
    %40 = vector.extract_strided_slice %37 {offsets = [0, 64], sizes = [8, 32], strides = [1, 1]} : vector<8x128xf32> to vector<8x32xf32>
    %41 = vector.extract_strided_slice %36 {offsets = [0, 96], sizes = [8, 32], strides = [1, 1]} : vector<8x128xf32> to vector<8x32xf32>
    %42 = arith.mulf %39, %25 : vector<8x32xf32>
    %43 = arith.mulf %38, %40 : vector<8x32xf32>
    %44 = arith.addf %42, %43 : vector<8x32xf32>
    %45 = math.tanh %44 : vector<8x32xf32>
    %46 = arith.mulf %41, %45 : vector<8x32xf32>
    %c0_20 = arith.constant 0 : index
    %c0_21 = arith.constant 0 : index
    %47 = vector.load %arg9[%c0_20, %c0_21] : memref<8x32xf32, #tpu.memory_space<vmem>>, vector<8x32xf32>
    %c0_22 = arith.constant 0 : index
    %c0_23 = arith.constant 0 : index
    %48 = vector.load %arg10[%c0_22, %c0_23] : memref<8x32xf32, #tpu.memory_space<vmem>>, vector<8x32xf32>
    %49 = tpu.concatenate %46, %47 in 1 : vector<8x32xf32>, vector<8x32xf32> -> vector<8x64xf32>
    %c0_24 = arith.constant 0 : index
    %c0_25 = arith.constant 0 : index
    %50 = vector.load %arg11[%c0_24, %c0_25] : memref<64x128xf32, #tpu.memory_space<vmem>>, vector<64x128xf32>
    %cst_26 = arith.constant dense<0.000000e+00> : vector<8x128xf32>
    %51 = tpu.matmul %49, %50, %cst_26 {dimension_numbers = #tpu.dot_dimension_numbers<[1], [0], [0], [1], [0, 0, 1, 1], [], []>} : vector<8x64xf32>, vector<64x128xf32>, vector<8x128xf32> -> vector<8x128xf32>
    %c0_27 = arith.constant 0 : index
    %c0_28 = arith.constant 0 : index
    %52 = vector.load %arg12[%c0_27, %c0_28] : memref<1x128xf32, #tpu.memory_space<vmem>>, vector<1x128xf32>
    %53 = vector.broadcast %52 : vector<1x128xf32> to vector<8x128xf32>
    %54 = arith.addf %51, %53 : vector<8x128xf32>
    %55 = arith.negf %54 : vector<8x128xf32>
    %56 = math.exp %55 : vector<8x128xf32>
    %cst_29 = arith.constant 1.000000e+00 : f32
    %57 = vector.broadcast %cst_29 : f32 to vector<8x128xf32>
    %58 = arith.addf %57, %56 : vector<8x128xf32>
    %59 = arith.divf %57, %58 : vector<8x128xf32>
    %60 = math.tanh %54 : vector<8x128xf32>
    %61 = vector.extract_strided_slice %59 {offsets = [0, 0], sizes = [8, 32], strides = [1, 1]} : vector<8x128xf32> to vector<8x32xf32>
    %62 = vector.extract_strided_slice %59 {offsets = [0, 32], sizes = [8, 32], strides = [1, 1]} : vector<8x128xf32> to vector<8x32xf32>
    %63 = vector.extract_strided_slice %60 {offsets = [0, 64], sizes = [8, 32], strides = [1, 1]} : vector<8x128xf32> to vector<8x32xf32>
    %64 = vector.extract_strided_slice %59 {offsets = [0, 96], sizes = [8, 32], strides = [1, 1]} : vector<8x128xf32> to vector<8x32xf32>
    %65 = arith.mulf %62, %48 : vector<8x32xf32>
    %66 = arith.mulf %61, %63 : vector<8x32xf32>
    %67 = arith.addf %65, %66 : vector<8x32xf32>
    %68 = math.tanh %67 : vector<8x32xf32>
    %69 = arith.mulf %64, %68 : vector<8x32xf32>
    %70 = tpu.concatenate %23, %21, %46, %44, %69, %67 in 1 : vector<8x32xf32>, vector<8x32xf32>, vector<8x32xf32>, vector<8x32xf32>, vector<8x32xf32>, vector<8x32xf32> -> vector<8x192xf32>
    %cst_30 = arith.constant 0.000000e+00 : f32
    %71 = vector.broadcast %cst_30 : f32 to vector<8x64xf32>
    %72 = tpu.concatenate %70, %71 in 1 : vector<8x192xf32>, vector<8x64xf32> -> vector<8x256xf32>
    %c0_31 = arith.constant 0 : index
    %c0_32 = arith.constant 0 : index
    %73 = vector.load %arg13[%c0_31, %c0_32] : memref<8x256xf32, #tpu.memory_space<vmem>>, vector<8x256xf32>
    tpu.vector_store %arg13[%c0_31, %c0_32], %72 {strides = array<i32>} : memref<8x256xf32, #tpu.memory_space<vmem>>, vector<8x256xf32>,
    return
  }
}

</mosaic_0001>

<bundles_post_ra>
// kernel: tpu_custom_call.1
= control target key start
LH: loop header
LB: loop body
LE: loop exit
PB: predicated region body
PF: predicated region fallthrough
CT: control target
= control target key end

     0   :  { %18 = vsyncpa [#allocation3], 0  ;;  %s1135_s0 = inlined_call_operand.hbm [shape: f32[8,32], index: 0, kind: input, shape index: {}]   ;;  %s1136_s1 = inlined_call_operand.hbm [shape: f32[8,32], index: 1, kind: input, shape index: {}]   ;;  %s1137_s2 = inlined_call_operand.hbm [shape: f32[8,32], index: 2, kind: input, shape index: {}]   ;;  %s1138_s3 = inlined_call_operand.hbm [shape: f32[64,128], index: 3, kind: input, shape index: {}]   ;;  %s1139_s4 = inlined_call_operand.vmem [shape: f32[1,128], index: 4, kind: input, shape index: {}]   ;;  %s1140_s5 = inlined_call_operand.vmem [shape: f32[8,32], index: 5, kind: input, shape index: {}]   ;;  %s1141_s6 = inlined_call_operand.vmem [shape: f32[8,32], index: 6, kind: input, shape index: {}]   ;;  %s1142_s7 = inlined_call_operand.hbm [shape: f32[64,128], index: 7, kind: input, shape index: {}]   ;;  %s1143_s8 = inlined_call_operand.vmem [shape: f32[1,128], index: 8, kind: input, shape index: {}]   ;;  %s1144_s9 = inlined_call_operand.vmem [shape: f32[8,32], index: 9, kind: input, shape index: {}]   ;;  %s1145_s10 = inlined_call_operand.vmem [shape: f32[8,32], index: 10, kind: input, shape index: {}]   ;;  %s1146_s11 = inlined_call_operand.hbm [shape: f32[64,128], index: 11, kind: input, shape index: {}]   ;;  %s1147_s12 = inlined_call_operand.vmem [shape: f32[1,128], index: 12, kind: input, shape index: {}]   ;;  %s1148_s13 = inlined_call_operand.hbm [shape: f32[8,256], index: 13, kind: output, shape index: {}]  }
   0x1   :  { %19 = vsyncpa [#allocation6], 0 }
   0x2   :  { %20 = vsyncpa [#allocation9], 0 }
   0x3   :  { %21 = vsyncpa [#allocation12], 0 }
   0x4   :  { %22 = vsyncpa [#allocation4], 0  ;;  %s870_s25 = smov [#allocation5]   ;;  %s871_s27 = smov [#allocation8]  }
   0x5   :  { %s39_s26 = sshll.u32 %s870_s25, 4  ;;  %s58_s28 = sshll.u32 %s871_s27, 4  ;;  %s40_s26 = int_to_ptr.vmem [resolvable:$true] %s39_s26  ;;  %s955_s28 = int_to_ptr.vmem [resolvable:$true] %s58_s28 }
   0x6   :  { %s706_s14 = scalar_lea.hbm %s1136_s1, 128 }
   0x7   :  { %p707_p0 = scmp.ne.s32.totalorder %s1136_s1, %s706_s14  ;;  %p710_p1 = scmp.lt.u32.totalorder %s706_s14, %s1136_s1 }
   0x9   :  { %p712_p2 = pnand %p710_p1, %p707_p0 }
   0xb   :  { %715 = shalt.err (!%p712_p2)
}
   0xc   :  { %s716_s19 = scalar_lea.vmem %s40_s26, 128  ;;  %p721_p4 = scmp.lt.s32.totalorder %s40_s26, %s40_s26 }
   0xd   :  { %p717_p3 = scmp.ne.s32.totalorder %s40_s26, %s716_s19  ;;  %p722_p5 = scmp.lt.s32.totalorder %s716_s19, %s716_s19 }
   0xf   :  { %p723_p6 = por %p722_p5, %p721_p4 }
  0x11   :  { %p724_p7 = pnand %p723_p6, %p717_p3 }
  0x13   :  { %727 = shalt.err (!%p724_p7)
}
  0x14   :  { %42 = dma.hbm_to_vmem [thread:$0]  %s1136_s1, 128, %s40_s26, [#allocation6]  }
  0x15   :  { %s728_s24 = scalar_lea.hbm %s1138_s3, 1024 }
  0x16   :  { %p729_p8 = scmp.ne.s32.totalorder %s1138_s3, %s728_s24  ;;  %p732_p9 = scmp.lt.u32.totalorder %s728_s24, %s1138_s3 }
  0x18   :  { %p734_p10 = pnand %p732_p9, %p729_p8 }
  0x1a   :  { %737 = shalt.err (!%p734_p10)
}
  0x1b   :  { %s738_s14 = scalar_lea.vmem %s955_s28, 1024  ;;  %p743_p12 = scmp.lt.s32.totalorder %s955_s28, %s955_s28 }
  0x1c   :  { %p739_p11 = scmp.ne.s32.totalorder %s955_s28, %s738_s14  ;;  %p744_p13 = scmp.lt.s32.totalorder %s738_s14, %s738_s14 }
  0x1e   :  { %p745_p0 = por %p744_p13, %p743_p12 }
  0x20   :  { %p746_p1 = pnand %p745_p0, %p739_p11 }
  0x22   :  { %749 = shalt.err (!%p746_p1)
}
  0x23   :  { %s872_s1 = smov 128   ;;  %s873_s26 = smov 8  }
  0x24   :  { %64 = dma.hbm_to_vmem [thread:$0]  %s1138_s3, 1024, %s955_s28, [#allocation9], %s872_s1, %s872_s1, %s873_s26  }
  0x25   :  { %s874_s17 = smov [#allocation2]   ;;  %s875_s19 = smov [#allocation7]  }
  0x26   :  { %s29_s18 = sshll.u32 %s874_s17, 4  ;;  %s49_s20 = sshll.u32 %s875_s19, 4  ;;  %s30_s18 = int_to_ptr.vmem [resolvable:$true] %s29_s18  ;;  %s50_s20 = int_to_ptr.vmem [resolvable:$true] %s49_s20 }
  0x27   :  { %s750_s23 = scalar_lea.hbm %s1135_s0, 128 }
  0x28   :  { %p751_p2 = scmp.ne.s32.totalorder %s1135_s0, %s750_s23  ;;  %p754_p3 = scmp.lt.u32.totalorder %s750_s23, %s1135_s0 }
  0x2a   :  { %p756_p4 = pnand %p754_p3, %p751_p2 }
  0x2c   :  { %759 = shalt.err (!%p756_p4)
}
  0x2d   :  { %s760_s3 = scalar_lea.vmem %s30_s18, 128  ;;  %p765_p6 = scmp.lt.s32.totalorder %s30_s18, %s30_s18 }
  0x2e   :  { %p761_p5 = scmp.ne.s32.totalorder %s30_s18, %s760_s3  ;;  %p766_p7 = scmp.lt.s32.totalorder %s760_s3, %s760_s3 }
  0x30   :  { %p767_p8 = por %p766_p7, %p765_p6 }
  0x32   :  { %p768_p9 = pnand %p767_p8, %p761_p5 }
  0x34   :  { %771 = shalt.err (!%p768_p9)
}
  0x35   :  { %32 = dma.hbm_to_vmem [thread:$0]  %s1135_s0, 128, %s30_s18, [#allocation3]  }
  0x36   :  { %s772_s16 = scalar_lea.hbm %s1137_s2, 128 }
  0x37   :  { %p773_p10 = scmp.ne.s32.totalorder %s1137_s2, %s772_s16  ;;  %p776_p11 = scmp.lt.u32.totalorder %s772_s16, %s1137_s2 }
  0x39   :  { %p778_p12 = pnand %p776_p11, %p773_p10 }
  0x3b   :  { %781 = shalt.err (!%p778_p12)
}
  0x3c   :  { %s782_s23 = scalar_lea.vmem %s50_s20, 128  ;;  %p787_p0 = scmp.lt.s32.totalorder %s50_s20, %s50_s20 }
  0x3d   :  { %p783_p13 = scmp.ne.s32.totalorder %s50_s20, %s782_s23  ;;  %p788_p1 = scmp.lt.s32.totalorder %s782_s23, %s782_s23 }
  0x3f   :  { %p789_p2 = por %p788_p1, %p787_p0 }
  0x41   :  { %p790_p3 = pnand %p789_p2, %p783_p13 }
  0x43   :  { %793 = shalt.err (!%p790_p3)
}
  0x44   :  { %52 = dma.hbm_to_vmem [thread:$0]  %s1137_s2, 128, %s50_s20, [#allocation6]  }
  0x45   :  { %s876_s24 = smov [#allocation10]   ;;  %s877_s27 = smov [#allocation11]  }
  0x46   :  { %s76_s25 = sshll.u32 %s876_s24, 4  ;;  %s94_s29 = sshll.u32 %s877_s27, 4  ;;  %s77_s25 = int_to_ptr.vmem [resolvable:$true] %s76_s25  ;;  %s1013_s29 = int_to_ptr.vmem [resolvable:$true] %s94_s29 }
  0x47   :  { %s794_s30 = scalar_lea.hbm %s1142_s7, 1024 }
  0x48   :  { %p795_p4 = scmp.ne.s32.totalorder %s1142_s7, %s794_s30  ;;  %p798_p5 = scmp.lt.u32.totalorder %s794_s30, %s1142_s7 }
  0x4a   :  { %p800_p6 = pnand %p798_p5, %p795_p4 }
  0x4c   :  { %803 = shalt.err (!%p800_p6)
}
  0x4d   :  { %s804_s2 = scalar_lea.vmem %s77_s25, 1024  ;;  %p809_p8 = scmp.lt.s32.totalorder %s77_s25, %s77_s25 }
  0x4e   :  { %p805_p7 = scmp.ne.s32.totalorder %s77_s25, %s804_s2  ;;  %p810_p9 = scmp.lt.s32.totalorder %s804_s2, %s804_s2 }
  0x50   :  { %p811_p10 = por %p810_p9, %p809_p8 }
  0x52   :  { %p812_p11 = pnand %p811_p10, %p805_p7 }
  0x54   :  { %815 = shalt.err (!%p812_p11)
}
  0x55   :  { %82 = dma.hbm_to_vmem [thread:$0]  %s1142_s7, 1024, %s77_s25, [#allocation9], %s872_s1, %s872_s1, %s873_s26  }
  0x56   :  { %s816_s23 = scalar_lea.hbm %s1146_s11, 1024 }
  0x57   :  { %p817_p12 = scmp.ne.s32.totalorder %s1146_s11, %s816_s23  ;;  %p820_p13 = scmp.lt.u32.totalorder %s816_s23, %s1146_s11 }
  0x59   :  { %p822_p0 = pnand %p820_p13, %p817_p12 }
  0x5b   :  { %825 = shalt.err (!%p822_p0)
}
  0x5c   :  { %s826_s3 = scalar_lea.vmem %s1013_s29, 1024  ;;  %p831_p2 = scmp.lt.s32.totalorder %s1013_s29, %s1013_s29 }
  0x5d   :  { %p827_p1 = scmp.ne.s32.totalorder %s1013_s29, %s826_s3  ;;  %p832_p3 = scmp.lt.s32.totalorder %s826_s3, %s826_s3 }
  0x5f   :  { %p833_p4 = por %p832_p3, %p831_p2 }
  0x61   :  { %p834_p5 = pnand %p833_p4, %p827_p1 }
  0x63   :  { %837 = shalt.err (!%p834_p5)
}
  0x64   :  { %100 = dma.hbm_to_vmem [thread:$0]  %s1146_s11, 1024, %s1013_s29, [#allocation12], %s872_s1, %s872_s1, %s873_s26  }
  0x65   :  { %860 = dma.done.wait [#allocation3], 128  }
  0x66   :  { %861 = vsyncadd [#allocation3], 4294967168 }
  0x67   :  { %862 = dma.done.wait [#allocation6], 256  }
  0x68   :  { %863 = vsyncadd [#allocation6], 4294967040 }
  0x69   :  { %864 = dma.done.wait [#allocation9], 2048  }
  0x6a   :  { %865 = vsyncadd [#allocation9], 4294965248 }
  0x6b   :  { %866 = dma.done.wait [#allocation12], 1024  }
  0x6c   :  { %867 = vsyncadd [#allocation12], 4294966272  ;;  %v878_v0 = vmov 0.0|0.0   ;;  %vm879_vm0 = vmmov 0   ;;  %v880_v1 = vmov 0.0   ;;  %v122_v2 = vld [vmem:[#allocation5] sm:$0xff] }
  0x6d   :  { %631 = vmatprep.subr.bf16.mxu0 %v878_v0  ;;  %643 = vmatprep.subr.bf16.mxu1 %v878_v0  ;;  %v130_v3 = vld [vmem:[#allocation8] sm:$0xff]  ;;  %v131_v4 = vld [vmem:[#allocation8 + $0x8] sm:$0xff]  ;;  %s881_s11 = smov 32   ;;  %v132_v6 = vld [vmem:[#allocation8 + $0x10] sm:$0xff]  ;;  %vm128_vm1 = vcmask 261120   ;;  %vm145_vm2 = vcmask 523264  }
  0x6e   :  { %590 = vmatprep.mubr.msk.f32.mxu0 %vm879_vm0, %v880_v1  ;;  %609 = vmatprep.mubr.msk.f32.mxu1 %vm879_vm0, %v880_v1  ;;  %v632_v5 = vpack.c.bf16 %v131_v4, %v130_v3  ;;  %v133_v7 = vld [vmem:[#allocation8 + $0x18] sm:$0xff]  ;;  %v134_v10 = vld [vmem:[#allocation8 + $0x20] sm:$0xff]  ;;  %v135_v11 = vld [vmem:[#allocation8 + $0x28] sm:$0xff]  ;;  %s882_s29 = smov 64   ;;  %vm514_vm3 = vcmask 785408  }
  0x6f   :  { %125 = vrot.lane.b32.xlu0 %v122_v2, %s881_s11  ;;  %v635_v8 = vpack.c.bf16 %v133_v7, %v132_v6  ;;  %v123_v9 = vld [vmem:[#allocation7] sm:$0xff]  ;;  %v638_v12 = vpack.c.bf16 %v135_v11, %v134_v10  ;;  %v136_v13 = vld [vmem:[#allocation8 + $0x30] sm:$0xff]  ;;  %v121_v16 = vld [vmem:[#allocation2] sm:$0xff] }
  0x70   :  { %633 = vmatpush3.bf16.msra.mxu0 %v632_v5  ;;  %227 = vrot.lane.b32.xlu1 %v123_v9, %s881_s11  ;;  %v137_v14 = vld [vmem:[#allocation8 + $0x38] sm:$0xff]  ;;  %v538_v19 = vld [vmem:[%s1139_s4] ss:$0 sm:$0xff]  ;;  %v258_v34 = vld [vmem:[#allocation10] sm:$0xff] }
  0x71   :  { %634 = vmatprep.subr.bf16.mxu0 %v878_v0  ;;  %v641_v15 = vpack.c.bf16 %v137_v14, %v136_v13  ;;  %v259_v35 = vld [vmem:[#allocation10 + $0x8] sm:$0xff]  ;;  %v260_v36 = vld [vmem:[#allocation10 + $0x10] sm:$0xff]  ;;  %v261_v38 = vld [vmem:[#allocation10 + $0x18] sm:$0xff] }
  0x72   :  { %v644_v37 = vpack.c.bf16 %v259_v35, %v258_v34  ;;  %v647_v39 = vpack.c.bf16 %v261_v38, %v260_v36  ;;  %v262_v40 = vld [vmem:[#allocation10 + $0x20] sm:$0xff]  ;;  %v263_v41 = vld [vmem:[#allocation10 + $0x28] sm:$0xff]  ;;  %v264_v43 = vld [vmem:[#allocation10 + $0x30] sm:$0xff] }
  0x73   :  { %v650_v42 = vpack.c.bf16 %v263_v41, %v262_v40  ;;  %v265_v44 = vld [vmem:[#allocation10 + $0x38] sm:$0xff]  ;;  %v247_v47 = vld [vmem:[%s1140_s5] sm:$0xff]  ;;  %v385_v6 = vld [vmem:[#allocation11] sm:$0xff] }
  0x74   :  { %636 = vmatpush3.bf16.msra.mxu0 %v635_v8  ;;  %645 = vmatpush3.bf16.msra.mxu1 %v644_v37  ;;  %v653_v46 = vpack.c.bf16 %v265_v44, %v264_v43  ;;  %v248_v48 = vld [vmem:[%s1141_s6] sm:$0xff]  ;;  %v387_v8 = vld [vmem:[#allocation11 + $0x10] sm:$0xff]  ;;  %v388_v10 = vld [vmem:[#allocation11 + $0x18] sm:$0xff] }
  0x75   :  { %637 = vmatprep.subr.bf16.mxu0 %v878_v0  ;;  %646 = vmatprep.subr.bf16.mxu1 %v878_v0  ;;  %v541_v54 = vld [vmem:[%s1143_s8] ss:$0 sm:$0xff]  ;;  %v659_v11 = vpack.c.bf16 %v388_v10, %v387_v8 }
  0x76   :  { %v386_v7 = vld [vmem:[#allocation11 + $0x8] sm:$0xff] }
  0x77   :  { %v656_v9 = vpack.c.bf16 %v386_v7, %v385_v6  ;;  %v390_v13 = vld [vmem:[#allocation11 + $0x28] sm:$0xff] }
  0x78   :  { %639 = vmatpush3.bf16.msra.mxu0 %v638_v12  ;;  %648 = vmatpush3.bf16.msra.mxu1 %v647_v39  ;;  %v389_v12 = vld [vmem:[#allocation11 + $0x20] sm:$0xff] }
  0x79   :  { %640 = vmatprep.subr.bf16.mxu0 %v878_v0  ;;  %649 = vmatprep.subr.bf16.mxu1 %v878_v0  ;;  %v662_v14 = vpack.c.bf16 %v390_v13, %v389_v12 }
  0x7c   :  { %642 = vmatpush3.bf16.msra.mxu0 %v641_v15  ;;  %651 = vmatpush3.bf16.msra.mxu1 %v650_v42  ;;  %v391_v15 = vld [vmem:[#allocation11 + $0x30] sm:$0xff] }
  0x7d   :  { %655 = vmatprep.subr.bf16.mxu0 %v878_v0  ;;  %652 = vmatprep.subr.bf16.mxu1 %v878_v0 }
  0x80   :  { %654 = vmatpush3.bf16.msra.mxu1 %v653_v46 }
  0xe1   :  { %v126_v17 = vpop.permute.xlu0 %125 }
  0xe2   :  { %v129_v18 = vsel %vm128_vm1, %v121_v16, %v126_v17  ;;  %v228_v30 = vpop.permute.xlu1 %227  ;;  %v392_v16 = vld [vmem:[#allocation11 + $0x38] sm:$0xff] }
  0xe3   :  { %591 = vmatmul.mubr.msk.f32.vlgmr.msra.gmra.mrb[0].mxu0 %vm145_vm2, %v129_v18  ;;  %v665_v18 = vpack.c.bf16 %v392_v16, %v391_v15 }
  0xe4   :  { %628 = vmatprep.mubr.msk.f32.mxu0 %vm879_vm0, %v880_v1  ;;  %657 = vmatpush3.bf16.msra.mxu0 %v656_v9 }
  0xe5   :  { %658 = vmatprep.subr.bf16.mxu0 %v878_v0 }
  0xe8   :  { %660 = vmatpush3.bf16.msra.mxu0 %v659_v11 }
  0xe9   :  { %661 = vmatprep.subr.bf16.mxu0 %v878_v0 }
  0xec   :  { %663 = vmatpush3.bf16.msra.mxu0 %v662_v14 }
  0xed   :  { %664 = vmatprep.subr.bf16.mxu0 %v878_v0  ;;  %v544_v0 = vld [vmem:[%s1147_s12] ss:$0 sm:$0xff]  ;;  %s884_s12 = smov [#allocation13]  }
  0xee   :  { %s526_s20 = sshll.u32 %s884_s12, 4  ;;  %s527_s20 = int_to_ptr.vmem [resolvable:$true] %s526_s20 }
  0xef   :  { %s838_s19 = scalar_lea.vmem %s527_s20, 256  ;;  %p843_p7 = scmp.lt.s32.totalorder %s527_s20, %s527_s20 }
  0xf0   :  { %666 = vmatpush3.bf16.msra.mxu0 %v665_v18  ;;  %p839_p6 = scmp.ne.s32.totalorder %s527_s20, %s838_s19  ;;  %p844_p8 = scmp.lt.s32.totalorder %s838_s19, %s838_s19 }
  0xf2   :  { %p845_p9 = por %p844_p8, %p843_p7 }
  0xf4   :  { %p846_p10 = pnand %p845_p9, %p839_p6 }
 0x1b6   :  { %v215_v20 = vpop.f32.mrb[0].mxu0 }
 0x1b7   :  { %v216_v21 = vadd.f32 %v538_v19, %v215_v20  ;;  %v592_v22 = vpop.f32.mrb[1].mxu0  ;;  %v374_v19 = vld [vmem:[%s1144_s9] sm:$0xff] }
 0x1b8   :  { %v375_v20 = vld [vmem:[%s1145_s10] sm:$0xff]  ;;  %s883_s10 = smov 96  }
 0x1b9   :  { %682 = vtanh.f32 %v216_v21  ;;  %v540_v24 = vmul.f32 -1.442695, %v216_v21 }
 0x1bb   :  { %684 = vpow2.f32 %v540_v24 }
 0x1c3   :  { %v683_v23 = vpop.eup %682 }
 0x1c4   :  { %232 = vrot.lane.b32.xlu0 %v683_v23, %s882_s29 }
 0x1c5   :  { %v685_v25 = vpop.eup %684 }
 0x1c6   :  { %v222_v26 = vadd.f32 1.0, %v685_v25 }
 0x1c8   :  { %686 = vrcp.f32 %v222_v26 }
 0x1d2   :  { %v687_v27 = vpop.eup %686 }
 0x1d3   :  { %v230_v31 = vmul.f32 %v687_v27, %v228_v30 }
 0x236   :  { %v233_v28 = vpop.permute.xlu0 %232 }
 0x237   :  { %v235_v29 = vmul.f32 %v687_v27, %v233_v28 }
 0x239   :  { %237 = vrot.lane.b32.xlu1 %v235_v29, %s881_s11 }
 0x2ab   :  { %v238_v32 = vpop.permute.xlu1 %237 }
 0x2ac   :  { %v1068_v33 = vadd.f32 %v238_v32, %v230_v31 }
 0x2ae   :  { %688 = vtanh.f32 %v1068_v33 }
 0x2b8   :  { %v689_v45 = vpop.eup %688 }
 0x2b9   :  { %243 = vrot.lane.b32.xlu0 %v689_v45, %s882_s29 }
 0x2bd   :  { %254 = vrot.lane.b32.xlu0 %v247_v47, %s881_s11 }
 0x2c1   :  { %354 = vrot.lane.b32.xlu0 %v248_v48, %s881_s11 }
 0x32b   :  { %v244_v49 = vpop.permute.xlu0 %243 }
 0x32c   :  { %v246_v50 = vmul.f32 %v687_v27, %v244_v49 }
 0x32e   :  { %250 = vrot.lane.b32.xlu1 %v246_v50, %s881_s11 }
 0x32f   :  { %v255_v51 = vpop.permute.xlu0 %254 }
 0x333   :  { %v355_v2 = vpop.permute.xlu0 %354 }
 0x3a0   :  { %v1084_v52 = vpop.permute.xlu1 %250 }
 0x3a1   :  { %v257_v53 = vsel %vm128_vm1, %v1084_v52, %v255_v51  ;;  %v512_v42 = vsel %vm128_vm1, %v1084_v52, %v1068_v33 }
 0x3a2   :  { %610 = vmatmul.mubr.msk.f32.vlgmr.msra.gmra.mrb[0].mxu1 %vm145_vm2, %v257_v53 }
 0x475   :  { %v342_v55 = vpop.f32.mrb[0].mxu1 }
 0x476   :  { %v343_v56 = vadd.f32 %v541_v54, %v342_v55  ;;  %v611_v57 = vpop.f32.mrb[1].mxu1 }
 0x478   :  { %690 = vtanh.f32 %v343_v56  ;;  %v543_v59 = vmul.f32 -1.442695, %v343_v56 }
 0x47a   :  { %692 = vpow2.f32 %v543_v59 }
 0x482   :  { %v691_v58 = vpop.eup %690 }
 0x483   :  { %359 = vrot.lane.b32.xlu1 %v691_v58, %s882_s29 }
 0x484   :  { %v693_v60 = vpop.eup %692 }
 0x485   :  { %v349_v61 = vadd.f32 1.0, %v693_v60 }
 0x487   :  { %694 = vrcp.f32 %v349_v61 }
 0x491   :  { %v695_v62 = vpop.eup %694 }
 0x492   :  { %v357_v3 = vmul.f32 %v695_v62, %v355_v2 }
 0x4f5   :  { %v360_v63 = vpop.permute.xlu1 %359 }
 0x4f6   :  { %v362_v1 = vmul.f32 %v695_v62, %v360_v63 }
 0x4f8   :  { %364 = vrot.lane.b32.xlu1 %v362_v1, %s881_s11 }
 0x56a   :  { %v365_v4 = vpop.permute.xlu1 %364 }
 0x56b   :  { %v367_v5 = vadd.f32 %v365_v4, %v357_v3 }
 0x56d   :  { %696 = vtanh.f32 %v367_v5 }
 0x577   :  { %v697_v17 = vpop.eup %696 }
 0x578   :  { %370 = vrot.lane.b32.xlu0 %v697_v17, %s882_s29 }
 0x57c   :  { %381 = vrot.lane.b32.xlu0 %v374_v19, %s881_s11 }
 0x580   :  { %481 = vrot.lane.b32.xlu0 %v375_v20, %s881_s11 }
 0x5ea   :  { %v371_v21 = vpop.permute.xlu0 %370 }
 0x5eb   :  { %v373_v22 = vmul.f32 %v695_v62, %v371_v21 }
 0x5ed   :  { %377 = vrot.lane.b32.xlu1 %v373_v22, %s881_s11 }
 0x5ee   :  { %v382_v23 = vpop.permute.xlu0 %381 }
 0x5f2   :  { %v482_v37 = vpop.permute.xlu0 %481 }
 0x65f   :  { %v378_v24 = vpop.permute.xlu1 %377 }
 0x660   :  { %v384_v25 = vsel %vm128_vm1, %v378_v24, %v382_v23 }
 0x661   :  { %629 = vmatmul.mubr.msk.f32.vlgmr.msra.gmra.mrb[2].mxu0 %vm145_vm2, %v384_v25 }
 0x734   :  { %v469_v26 = vpop.f32.mrb[2].mxu0 }
 0x735   :  { %v470_v27 = vadd.f32 %v544_v0, %v469_v26  ;;  %v630_v28 = vpop.f32.mrb[3].mxu0 }
 0x737   :  { %698 = vtanh.f32 %v470_v27  ;;  %v546_v30 = vmul.f32 -1.442695, %v470_v27 }
 0x739   :  { %700 = vpow2.f32 %v546_v30 }
 0x741   :  { %v699_v29 = vpop.eup %698 }
 0x742   :  { %486 = vrot.lane.b32.xlu1 %v699_v29, %s882_s29 }
 0x743   :  { %v701_v31 = vpop.eup %700 }
 0x744   :  { %v476_v32 = vadd.f32 1.0, %v701_v31 }
 0x746   :  { %702 = vrcp.f32 %v476_v32 }
 0x750   :  { %v703_v34 = vpop.eup %702 }
 0x751   :  { %v484_v38 = vmul.f32 %v703_v34, %v482_v37 }
 0x7b4   :  { %v487_v35 = vpop.permute.xlu1 %486 }
 0x7b5   :  { %v489_v36 = vmul.f32 %v703_v34, %v487_v35 }
 0x7b7   :  { %491 = vrot.lane.b32.xlu1 %v489_v36, %s881_s11 }
 0x7bb   :  { %501 = vrot.lane.b32.xlu1 %v373_v22, %s883_s10 }
 0x7bf   :  { %505 = vrot.lane.b32.xlu1 %v367_v5, %s882_s29 }
 0x829   :  { %v492_v39 = vpop.permute.xlu1 %491 }
 0x82a   :  { %v494_v40 = vadd.f32 %v492_v39, %v484_v38 }
 0x82c   :  { %704 = vtanh.f32 %v494_v40 }
 0x82d   :  { %v502_v41 = vpop.permute.xlu1 %501 }
 0x82e   :  { %v513_v43 = vsel %vm145_vm2, %v512_v42, %v502_v41 }
 0x831   :  { %v506_v44 = vpop.permute.xlu1 %505 }
 0x832   :  { %v515_v45 = vsel %vm514_vm3, %v513_v43, %v506_v44 }
 0x833   :  { %518 = vst [vmem:[#allocation13] sm:$0xff] %v515_v45 }
 0x836   :  { %v705_v46 = vpop.eup %704 }
 0x837   :  { %497 = vrot.lane.b32.xlu0 %v705_v46, %s882_s29 }
 0x8a9   :  { %v498_v47 = vpop.permute.xlu0 %497 }
 0x8aa   :  { %v500_v48 = vmul.f32 %v703_v34, %v498_v47 }
 0x8ac   :  { %509 = vrot.lane.b32.xlu0 %v500_v48, %s881_s11 }
 0x91e   :  { %v510_v49 = vpop.permute.xlu0 %509 }
 0x91f   :  { %v516_v50 = vsel %vm128_vm1, %v510_v49, %v494_v40 }
 0x920   :  { %v517_v33 = vsel %vm145_vm2, %v516_v50, 0.0 }
 0x921   :  { %519 = vst [vmem:[#allocation13 + $0x8] sm:$0xff] %v517_v33 }
 0x922   :  { %849 = shalt.err (!%p846_p10)
}
 0x923   :  { %s850_s23 = scalar_lea.hbm %s1148_s13, 256 }
 0x924   :  { %p851_p11 = scmp.ne.s32.totalorder %s1148_s13, %s850_s23  ;;  %p854_p12 = scmp.lt.u32.totalorder %s850_s23, %s1148_s13 }
 0x926   :  { %p856_p13 = pnand %p854_p12, %p851_p11 }
 0x928   :  { %859 = shalt.err (!%p856_p13)
}
 0x929   :  { %529 = dma.vmem_to_hbm [thread:$0]  %s527_s20, 256, %s1148_s13, [#allocation4]  }
 0x92a   :  { %868 = dma.done.wait [#allocation4], 256  }
 0x92b   :  { %869 = vsyncadd [#allocation4], 4294967040 }
 0x92c   :  { %533 = vsyncpa [#allocation3], 1 }
 0x92d   :  { %534 = vsyncpa [#allocation6], 1 }
 0x92e   :  { %535 = vsyncpa [#allocation9], 1 }
 0x92f   :  { %536 = vsyncpa [#allocation12], 1 }
 0x930   :  { %537 = vsyncpa [#allocation4], 1 }

</bundles_post_ra>
